<compile_context>
chip_gen: v6e
topology: v6e:2x2x1
jax: 0.10.0
libtpu: 0.0.40
codegen_flags: <defaults>
</compile_context>

<pallas_src>
import jax
import jax.numpy as jnp
from jax.experimental import pallas as pl
from jax.experimental.pallas import tpu as pltpu


def _round_up(v, m):
    return ((v + m - 1) // m) * m


def _vmem_budget_bytes():
    """Generation-aware VMEM budget (v5e/v6e: 128 MiB, v7x: 64 MiB physical)."""
    cap = 64 * 1024 * 1024  # conservative fallback = v7x per-core VMEM
    try:
        cap = int(pltpu.get_tpu_info().vmem_capacity_bytes)
    except Exception:
        pass
    return (cap * 3) // 4


def _residue_kernel(x_ref, w1_ref, b1_ref, w2_ref, b2_ref, o_ref):
    w1 = w1_ref[...]              # (C, C), resident in VMEM
    b1 = b1_ref[...]              # (C, 1), folded BN1 + conv bias
    w2 = w2_ref[...]
    b2 = b2_ref[...]
    mxu_dtype = w1.dtype          # f32 by default; bf16 when low-precision weights
    # bn is a trace-time constant (small); unrolled so each (C, T) slab is a
    # lane-dense MXU matmul. (For C <= 8 the MXU is underutilized, but the op
    # is HBM-bound at that size anyway.)
    for b in range(x_ref.shape[0]):
        x = x_ref[b]                                                  # (C, T)
        h = jnp.dot(w1, x.astype(mxu_dtype),
                    preferred_element_type=jnp.float32)
        h = jnp.maximum(h + b1, 0.0)                                  # BN1+ReLU
        h = jnp.dot(w2, h.astype(mxu_dtype),
                    preferred_element_type=jnp.float32)
        h = jnp.maximum(h + b2, 0.0)                                  # BN2+ReLU
        o_ref[b] = (x + h).astype(o_ref.dtype)                        # residual


def _make_specs(C, block, grid_rank, single_buffer_weights):
    if grid_rank == 2:
        tile_map = lambda n, l: (n, 0, l)
        const_map = lambda n, l: (0, 0)
    else:
        tile_map = lambda n: (n, 0, 0)
        const_map = lambda n: (0, 0)
    tile_spec = pl.BlockSpec(block, tile_map)
    if single_buffer_weights:
        # Constant index_map -> never re-DMA'd; a second pipeline buffer is
        # pure VMEM waste once the weights are large.
        w_spec = pl.BlockSpec((C, C), const_map, pipeline_mode=pl.Buffered(1))
        b_spec = pl.BlockSpec((C, 1), const_map, pipeline_mode=pl.Buffered(1))
    else:
        w_spec = pl.BlockSpec((C, C), const_map)
        b_spec = pl.BlockSpec((C, 1), const_map)
    return tile_spec, w_spec, b_spec


def residue_module(x, params, *, use_bf16_weights=False, donate_x=False):
    """x: (N, C, L) float32, PyTorch NCL layout.  Returns (N, C, L)."""
    N, C, L = x.shape
    w1, b1, w2, b2 = params
    if use_bf16_weights:
        # Accuracy tradeoff for large-C MXU-bound cases on v6e/v7x; gated.
        w1 = w1.astype(jnp.bfloat16)
        w2 = w2.astype(jnp.bfloat16)
    w_bytes = 2 if use_bf16_weights else 4

    budget = _vmem_budget_bytes()
    # Single-buffer the weights once they are big enough to matter (>= 1 MiB
    # each); keeps the small-C path on the default (well-tested) pipeline.
    single_buffer_weights = (C * C * w_bytes) >= (1 << 20)
    weight_bufs = 1 if single_buffer_weights else 2
    fixed = weight_bufs * 2 * (C * C * w_bytes + C * 4)   # w1,w2,b1,b2 buffers

    if L >= 128:
        # Lane-dense tiling along L, one batch element per step.
        # Per TL column of lanes: 2x in + 2x out (double-buffered) + ~4x f32
        # intermediates.
        per_tl = (2 + 2 + 4) * C * 4
        tl = ((budget - fixed) // per_tl) // 128 * 128
        tl = max(128, min(2048, tl))
        tl = min(tl, _round_up(L, 128))
        if N == 1 and pl.cdiv(L, tl) == 1 and L > 256:
            # Guarantee >=2 grid steps on a parallel axis so both v7x
            # TensorCores get work.
            tl = max(128, _round_up(pl.cdiv(L, 2), 128))
        grid = (N, pl.cdiv(L, tl))
        block = (1, C, tl)
        dims = ("parallel", "parallel")
    else:
        # Small L: block several batch elements per step (full (C, L) extent,
        # which satisfies the (8,128)/full-dim rule) to amortize per-step
        # overhead and DMA setup.
        bn = min(N, 8)
        grid = (pl.cdiv(N, bn),)
        block = (bn, C, L)
        dims = ("parallel",)

    tile_spec, w_spec, b_spec = _make_specs(C, block, len(grid),
                                            single_buffer_weights)

    cost = pl.CostEstimate(
        flops=4 * C * C * N * L,                              # two (C,C) matmuls
        transcendentals=0,
        bytes_accessed=2 * N * C * L * 4 + 2 * C * C * w_bytes + 2 * C * 4,
    )

    extra = {}
    if donate_x:
        # Safe: each x tile is fully consumed before its output tile is
        # written back. Only beneficial when the caller actually donates x.
        extra["input_output_aliases"] = {0: 0}

    return pl.pallas_call(
        _residue_kernel,
        out_shape=jax.ShapeDtypeStruct((N, C, L), x.dtype),
        grid=grid,
        in_specs=[tile_spec, w_spec, b_spec, w_spec, b_spec],
        out_specs=tile_spec,
        compiler_params=pltpu.CompilerParams(
            dimension_semantics=dims,
            vmem_limit_bytes=int(budget)),
        cost_estimate=cost,
        **extra,
    )(x, w1, b1, w2, b2)


def make_params(key, C, eps=1e-5):
    """Deterministic synthetic parameters matching _ResidueModule(C),
    with conv bias + eval-mode BatchNorm folded into the conv weights."""
    ks = jax.random.split(key, 8)
    # Conv1d(C, C, 1) weights: torch shape (C_out, C_in, 1) -> (C_out, C_in).
    w1 = jax.random.normal(ks[0], (C, C), jnp.float32) * 0.1
    b1 = jax.random.normal(ks[1], (C,), jnp.float32) * 0.1
    w2 = jax.random.normal(ks[2], (C, C), jnp.float32) * 0.1
    b2 = jax.random.normal(ks[3], (C,), jnp.float32) * 0.1
    # BatchNorm1d affine + running stats (eval mode), made non-trivial.
    g1 = 1.0 + 0.1 * jax.random.normal(ks[4], (C,), jnp.float32)
    beta1 = 0.1 * jax.random.normal(ks[5], (C,), jnp.float32)
    g2 = 1.0 + 0.1 * jax.random.normal(ks[6], (C,), jnp.float32)
    beta2 = 0.1 * jax.random.normal(ks[7], (C,), jnp.float32)
    rm1 = jnp.zeros((C,), jnp.float32); rv1 = jnp.ones((C,), jnp.float32)
    rm2 = jnp.zeros((C,), jnp.float32); rv2 = jnp.ones((C,), jnp.float32)
    # BN fold: y = (x - rm) * g / sqrt(rv + eps) + beta = x*s + t
    s1 = g1 / jnp.sqrt(rv1 + eps); t1 = beta1 - rm1 * s1
    s2 = g2 / jnp.sqrt(rv2 + eps); t2 = beta2 - rm2 * s2
    # Fold BN + conv bias into the weights (host side, once):
    #   BN(W x + b) = (s*W) x + (s*b + t)    [s scales output channels = rows]
    w1f = w1 * s1[:, None]
    b1f = (s1 * b1 + t1)[:, None]             # (C, 1) broadcasts along L
    w2f = w2 * s2[:, None]
    b2f = (s2 * b2 + t2)[:, None]
    return (w1f, b1f, w2f, b2f)


def _reference(x, params):
    """Pure-JAX reference of the same forward (NCL layout)."""
    w1, b1, w2, b2 = params
    h = jnp.maximum(jnp.einsum('oc,ncl->nol', w1, x) + b1[None, :, :], 0.0)
    h = jnp.maximum(jnp.einsum('oc,ncl->nol', w2, h) + b2[None, :, :], 0.0)
    return x + h


if __name__ == "__main__":
    key = jax.random.PRNGKey(0)
    kx, kp, kx2, kp2 = jax.random.split(key, 4)

    # Small shape implied by the module: batch=2, channels=4, spatial=16.
    N, C, L = 2, 4, 16
    x = jax.random.normal(kx, (N, C, L), jnp.float32)
    params = make_params(kp, C)
    out = jax.block_until_ready(residue_module(x, params))
    ref = _reference(x, params)
    assert out.shape == (N, C, L)
    assert jnp.allclose(out, ref, atol=1e-5, rtol=1e-5)

    # Second check: lane-dense tiled path with a ragged last L tile
    # (no host-side pad/slice), multiple tiles along L.
    N2, C2, L2 = 2, 8, 2200
    x2 = jax.random.normal(kx2, (N2, C2, L2), jnp.float32)
    params2 = make_params(kp2, C2)
    out2 = jax.block_until_ready(residue_module(x2, params2))
    ref2 = _reference(x2, params2)
    assert out2.shape == (N2, C2, L2)
    assert jnp.allclose(out2, ref2, atol=1e-4, rtol=1e-4)

    print("KERNEL_OK")
</pallas_src>

<mosaic_0001>
module attributes {stable_mosaic.version = 11 : i64} {
  func.func @_residue_kernel(%arg0: i32, %arg1: memref<2x4x16xf32, #tpu.memory_space<vmem>>, %arg2: memref<4x4xf32, #tpu.memory_space<vmem>>, %arg3: memref<4x1xf32, #tpu.memory_space<vmem>>, %arg4: memref<4x4xf32, #tpu.memory_space<vmem>>, %arg5: memref<4x1xf32, #tpu.memory_space<vmem>>, %arg6: memref<2x4x16xf32, #tpu.memory_space<vmem>>) attributes {dimension_semantics = [#tpu.dimension_semantics<parallel>], iteration_bounds = array<i64: 1>, scalar_prefetch = 0 : i64, scratch_operands = 0 : i64, tpu.core_type = #tpu.core_type<tc>, window_params = [{transform_indices = @transform_0, window_bounds = array<i64: 2, 4, 16>}, {pipeline_mode = #tpu.pipeline_mode<synchronous>, transform_indices = @transform_1, window_bounds = array<i64: 4, 4>}, {pipeline_mode = #tpu.pipeline_mode<synchronous>, transform_indices = @transform_2, window_bounds = array<i64: 4, 1>}, {pipeline_mode = #tpu.pipeline_mode<synchronous>, transform_indices = @transform_3, window_bounds = array<i64: 4, 4>}, {pipeline_mode = #tpu.pipeline_mode<synchronous>, transform_indices = @transform_4, window_bounds = array<i64: 4, 1>}, {transform_indices = @transform_5, window_bounds = array<i64: 2, 4, 16>}]} {
    %c0 = arith.constant 0 : index
    %c0_0 = arith.constant 0 : index
    %0 = vector.load %arg2[%c0, %c0_0] : memref<4x4xf32, #tpu.memory_space<vmem>>, vector<4x4xf32>
    %c0_1 = arith.constant 0 : index
    %c0_2 = arith.constant 0 : index
    %1 = vector.load %arg3[%c0_1, %c0_2] : memref<4x1xf32, #tpu.memory_space<vmem>>, vector<4x1xf32>
    %c0_3 = arith.constant 0 : index
    %c0_4 = arith.constant 0 : index
    %2 = vector.load %arg4[%c0_3, %c0_4] : memref<4x4xf32, #tpu.memory_space<vmem>>, vector<4x4xf32>
    %c0_5 = arith.constant 0 : index
    %c0_6 = arith.constant 0 : index
    %3 = vector.load %arg5[%c0_5, %c0_6] : memref<4x1xf32, #tpu.memory_space<vmem>>, vector<4x1xf32>
    %c0_7 = arith.constant 0 : index
    %c0_8 = arith.constant 0 : index
    %c0_9 = arith.constant 0 : index
    %4 = vector.load %arg1[%c0_7, %c0_8, %c0_9] : memref<2x4x16xf32, #tpu.memory_space<vmem>>, vector<1x4x16xf32>
    %5 = vector.shape_cast %4 : vector<1x4x16xf32> to vector<4x16xf32>
    %cst = arith.constant dense<0.000000e+00> : vector<4x16xf32>
    %6 = tpu.matmul %0, %5, %cst {dimension_numbers = #tpu.dot_dimension_numbers<[1], [0], [0], [1], [0, 0, 1, 1], [], []>} : vector<4x4xf32>, vector<4x16xf32>, vector<4x16xf32> -> vector<4x16xf32>
    %7 = vector.broadcast %1 : vector<4x1xf32> to vector<4x16xf32>
    %8 = arith.addf %6, %7 : vector<4x16xf32>
    %cst_10 = arith.constant 0.000000e+00 : f32
    %9 = vector.broadcast %cst_10 : f32 to vector<4x16xf32>
    %10 = arith.maximumf %8, %9 : vector<4x16xf32>
    %cst_11 = arith.constant dense<0.000000e+00> : vector<4x16xf32>
    %11 = tpu.matmul %2, %10, %cst_11 {dimension_numbers = #tpu.dot_dimension_numbers<[1], [0], [0], [1], [0, 0, 1, 1], [], []>} : vector<4x4xf32>, vector<4x16xf32>, vector<4x16xf32> -> vector<4x16xf32>
    %12 = vector.broadcast %3 : vector<4x1xf32> to vector<4x16xf32>
    %13 = arith.addf %11, %12 : vector<4x16xf32>
    %cst_12 = arith.constant 0.000000e+00 : f32
    %14 = vector.broadcast %cst_12 : f32 to vector<4x16xf32>
    %15 = arith.maximumf %13, %14 : vector<4x16xf32>
    %16 = arith.addf %5, %15 : vector<4x16xf32>
    %c0_13 = arith.constant 0 : index
    %c0_14 = arith.constant 0 : index
    %c0_15 = arith.constant 0 : index
    %17 = vector.load %arg6[%c0_13, %c0_14, %c0_15] : memref<2x4x16xf32, #tpu.memory_space<vmem>>, vector<1x4x16xf32>
    %18 = vector.shape_cast %17 : vector<1x4x16xf32> to vector<4x16xf32>
    %19 = vector.shape_cast %16 : vector<4x16xf32> to vector<1x4x16xf32>
    tpu.vector_store %arg6[%c0_13, %c0_14, %c0_15], %19 {strides = array<i32>} : memref<2x4x16xf32, #tpu.memory_space<vmem>>, vector<1x4x16xf32>,
    %c1 = arith.constant 1 : index
    %c0_16 = arith.constant 0 : index
    %c0_17 = arith.constant 0 : index
    %20 = vector.load %arg1[%c1, %c0_16, %c0_17] : memref<2x4x16xf32, #tpu.memory_space<vmem>>, vector<1x4x16xf32>
    %21 = vector.shape_cast %20 : vector<1x4x16xf32> to vector<4x16xf32>
    %cst_18 = arith.constant dense<0.000000e+00> : vector<4x16xf32>
    %22 = tpu.matmul %0, %21, %cst_18 {dimension_numbers = #tpu.dot_dimension_numbers<[1], [0], [0], [1], [0, 0, 1, 1], [], []>} : vector<4x4xf32>, vector<4x16xf32>, vector<4x16xf32> -> vector<4x16xf32>
    %23 = vector.broadcast %1 : vector<4x1xf32> to vector<4x16xf32>
    %24 = arith.addf %22, %23 : vector<4x16xf32>
    %cst_19 = arith.constant 0.000000e+00 : f32
    %25 = vector.broadcast %cst_19 : f32 to vector<4x16xf32>
    %26 = arith.maximumf %24, %25 : vector<4x16xf32>
    %cst_20 = arith.constant dense<0.000000e+00> : vector<4x16xf32>
    %27 = tpu.matmul %2, %26, %cst_20 {dimension_numbers = #tpu.dot_dimension_numbers<[1], [0], [0], [1], [0, 0, 1, 1], [], []>} : vector<4x4xf32>, vector<4x16xf32>, vector<4x16xf32> -> vector<4x16xf32>
    %28 = vector.broadcast %3 : vector<4x1xf32> to vector<4x16xf32>
    %29 = arith.addf %27, %28 : vector<4x16xf32>
    %cst_21 = arith.constant 0.000000e+00 : f32
    %30 = vector.broadcast %cst_21 : f32 to vector<4x16xf32>
    %31 = arith.maximumf %29, %30 : vector<4x16xf32>
    %32 = arith.addf %21, %31 : vector<4x16xf32>
    %c1_22 = arith.constant 1 : index
    %c0_23 = arith.constant 0 : index
    %c0_24 = arith.constant 0 : index
    %33 = vector.load %arg6[%c1_22, %c0_23, %c0_24] : memref<2x4x16xf32, #tpu.memory_space<vmem>>, vector<1x4x16xf32>
    %34 = vector.shape_cast %33 : vector<1x4x16xf32> to vector<4x16xf32>
    %35 = vector.shape_cast %32 : vector<4x16xf32> to vector<1x4x16xf32>
    tpu.vector_store %arg6[%c1_22, %c0_23, %c0_24], %35 {strides = array<i32>} : memref<2x4x16xf32, #tpu.memory_space<vmem>>, vector<1x4x16xf32>,
    return
  }
  func.func @transform_0(%arg0: i32) -> (i32, i32, i32) {
    %c0_i32 = arith.constant 0 : i32
    %c0_i32_0 = arith.constant 0 : i32
    %c0_i32_1 = arith.constant 0 : i32
    return %arg0, %c0_i32, %c0_i32_0 : i32, i32, i32
  }
  func.func @transform_1(%arg0: i32) -> (i32, i32) {
    %c0_i32 = arith.constant 0 : i32
    %c0_i32_0 = arith.constant 0 : i32
    %c0_i32_1 = arith.constant 0 : i32
    return %c0_i32, %c0_i32_0 : i32, i32
  }
  func.func @transform_2(%arg0: i32) -> (i32, i32) {
    %c0_i32 = arith.constant 0 : i32
    %c0_i32_0 = arith.constant 0 : i32
    %c0_i32_1 = arith.constant 0 : i32
    return %c0_i32, %c0_i32_0 : i32, i32
  }
  func.func @transform_3(%arg0: i32) -> (i32, i32) {
    %c0_i32 = arith.constant 0 : i32
    %c0_i32_0 = arith.constant 0 : i32
    %c0_i32_1 = arith.constant 0 : i32
    return %c0_i32, %c0_i32_0 : i32, i32
  }
  func.func @transform_4(%arg0: i32) -> (i32, i32) {
    %c0_i32 = arith.constant 0 : i32
    %c0_i32_0 = arith.constant 0 : i32
    %c0_i32_1 = arith.constant 0 : i32
    return %c0_i32, %c0_i32_0 : i32, i32
  }
  func.func @transform_5(%arg0: i32) -> (i32, i32, i32) {
    %c0_i32 = arith.constant 0 : i32
    %c0_i32_0 = arith.constant 0 : i32
    %c0_i32_1 = arith.constant 0 : i32
    return %arg0, %c0_i32, %c0_i32_0 : i32, i32, i32
  }
}

</mosaic_0001>

<bundles_post_ra>
// kernel: tpu_custom_call.1
= control target key start
LH: loop header
LB: loop body
LE: loop exit
PB: predicated region body
PF: predicated region fallthrough
CT: control target
= control target key end

     0   :  { %10 = vsyncpa [#allocation3], 0  ;;  %s536_s0 = inlined_call_operand.vmem [shape: f32[2,4,16], index: 0, kind: input, shape index: {}]   ;;  %s537_s1 = inlined_call_operand.hbm [shape: f32[4,4], index: 1, kind: input, shape index: {}]   ;;  %s538_s2 = inlined_call_operand.vmem [shape: f32[4,1], index: 2, kind: input, shape index: {}]   ;;  %s539_s3 = inlined_call_operand.vmem [shape: f32[4,4], index: 3, kind: input, shape index: {}]   ;;  %s540_s4 = inlined_call_operand.vmem [shape: f32[4,1], index: 4, kind: input, shape index: {}]   ;;  %s541_s5 = inlined_call_operand.hbm [shape: f32[2,4,16], index: 5, kind: output, shape index: {}]  }
   0x1   :  { %11 = vsyncpa [#allocation4], 0  ;;  %s466_s18 = smov [#allocation2]  }
   0x2   :  { %s20_s19 = sshll.u32 %s466_s18, 4  ;;  %s21_s19 = int_to_ptr.vmem [resolvable:$true] %s20_s19 }
   0x3   :  { %s430_s20 = scalar_lea.vmem %s21_s19, 64  ;;  %p435_p1 = scmp.lt.s32.totalorder %s21_s19, %s21_s19 }
   0x4   :  { %p431_p0 = scmp.ne.s32.totalorder %s21_s19, %s430_s20  ;;  %p436_p2 = scmp.lt.s32.totalorder %s430_s20, %s430_s20 }
   0x6   :  { %p437_p3 = por %p436_p2, %p435_p1 }
   0x8   :  { %p438_p4 = pnand %p437_p3, %p431_p0 }
   0xa   :  { %441 = shalt.err (!%p438_p4)
}
   0xb   :  { %23 = dma.hbm_to_vmem [thread:$0]  %s537_s1, 64, %s21_s19, [#allocation3]  }
   0xc   :  { %462 = dma.done.wait [#allocation3], 64  }
   0xd   :  { %463 = vsyncadd [#allocation3], 4294967232  ;;  %v467_v0 = vmov 0.0   ;;  %vm468_vm0 = vmmov 0   ;;  %v469_v1 = vmov 0   ;;  %vm47_vm1 = vcmask 1043456  }
   0xe   :  { %394 = vmatprep.subr.mxu0 %v467_v0  ;;  %396 = vmatprep.mubr.msk.f32.mxu0 %vm468_vm0, %v467_v0  ;;  %vm43_vm2 = vcmask 31744   ;;  %v37_v2 = vld [vmem:[%s536_s0] sm:$0xf]  ;;  %v381_v4 = vld [vmem:[%s536_s0 + $0x4] sm:$0xf]  ;;  %vm205_vm3 = vcmask 125952  }
   0xf   :  { %421 = vset.pattern.permute.xlu0 %v469_v1  ;;  %399 = vmatprep.subr.mxu1 %v467_v0  ;;  %v33_v3 = vld [vmem:[#allocation2] sm:$0xf] }
  0x10   :  { %401 = vmatprep.mubr.msk.f32.mxu1 %vm468_vm0, %v467_v0  ;;  %395 = vmatpush3.msk.msra.mxu0 %vm47_vm1, %v37_v2  ;;  %v34_v5 = vld [vmem:[%s538_s2] sm:$0xf] }
  0x11   :  { %397 = vmatmul.mubr.msk.f32.vlgmr.msra.gmra.mxu0 %vm43_vm2, %v33_v3  ;;  %404 = vmatprep.subr.mxu0 %v467_v0  ;;  %v36_v6 = vld [vmem:[%s540_s4] sm:$0xf] }
  0x12   :  { %405 = vmatpush3.msk.msra.mxu0 %vm47_vm1, %v381_v4  ;;  %406 = vmatprep.mubr.msk.f32.mxu0 %vm468_vm0, %v467_v0  ;;  %v35_v12 = vld [vmem:[%s539_s3] sm:$0xf]  ;;  %s470_s3 = smov [#allocation5]  }
  0x13   :  { %40 = vperm.xlu0 %421, %v34_v5   ;;  %s365_s4 = sshll.u32 %s470_s3, 4  ;;  %s366_s4 = int_to_ptr.vmem [resolvable:$true] %s365_s4 }
  0x14   :  { %s442_s30 = scalar_lea.vmem %s366_s4, 128  ;;  %p447_p6 = scmp.lt.s32.totalorder %s366_s4, %s366_s4 }
  0x15   :  { %407 = vmatmul.mubr.msk.f32.vlgmr.msra.gmra.mxu0 %vm43_vm2, %v33_v3  ;;  %p443_p5 = scmp.ne.s32.totalorder %s366_s4, %s442_s30  ;;  %p448_p7 = scmp.lt.s32.totalorder %s442_s30, %s442_s30 }
  0x17   :  { %124 = vperm.xlu0 %421, %v36_v6   ;;  %p449_p8 = por %p448_p7, %p447_p6 }
  0x19   :  { %p450_p9 = pnand %p449_p8, %p443_p5 }
  0x8e   :  { %v41_v7 = vpop.permute.xlu0 %40 }
  0x92   :  { %v125_v17 = vpop.permute.xlu0 %124 }
  0xd1   :  { %v117_v8 = vpop.f32.mrf.mxu0 }
  0xd2   :  { %v118_v9 = vadd.f32 %v117_v8, %v41_v7 }
  0xd3   :  { %v398_v10 = vpop.f32.mrf.mxu0 }
  0xd4   :  { %v121_v11 = vmax.f32 %v118_v9, 0.0 }
  0xd5   :  { %v278_v13 = vpop.f32.mrf.mxu0 }
  0xd6   :  { %v279_v14 = vadd.f32 %v278_v13, %v41_v7  ;;  %400 = vmatpush3.msk.msra.mxu1 %vm47_vm1, %v121_v11 }
  0xd7   :  { %402 = vmatmul.mubr.msk.f32.vlgmr.msra.gmra.mxu1 %vm43_vm2, %v35_v12  ;;  %v408_v15 = vpop.f32.mrf.mxu0  ;;  %409 = vmatprep.subr.mxu1 %v467_v0 }
  0xd8   :  { %v282_v16 = vmax.f32 %v279_v14, 0.0  ;;  %411 = vmatprep.mubr.msk.f32.mxu1 %vm468_vm0, %v467_v0 }
  0xda   :  { %410 = vmatpush3.msk.msra.mxu1 %vm47_vm1, %v282_v16 }
  0xdb   :  { %412 = vmatmul.mubr.msk.f32.vlgmr.msra.gmra.mxu1 %vm43_vm2, %v35_v12 }
 0x197   :  { %v199_v18 = vpop.f32.mrf.mxu1 }
 0x198   :  { %v200_v19 = vadd.f32 %v199_v18, %v125_v17 }
 0x199   :  { %v403_v20 = vpop.f32.mrf.mxu1 }
 0x19a   :  { %v203_v21 = vmax.f32 %v200_v19, 0.0 }
 0x19b   :  { %v352_v22 = vpop.f32.mrf.mxu1 }
 0x19c   :  { %v204_v23 = vadd.f32 %v203_v21, %v37_v2  ;;  %v353_v24 = vadd.f32 %v352_v22, %v125_v17 }
 0x19d   :  { %v413_v25 = vpop.f32.mrf.mxu1 }
 0x19e   :  { %206 = vst.msk [vmem:[#allocation5] sm:$0xf] %vm205_vm3, %v204_v23  ;;  %v356_v26 = vmax.f32 %v353_v24, 0.0 }
 0x1a0   :  { %v357_v27 = vadd.f32 %v381_v4, %v356_v26 }
 0x1a2   :  { %359 = vst.msk [vmem:[#allocation5 + $0x4] sm:$0xf] %vm205_vm3, %v357_v27 }
 0x1a3   :  { %453 = shalt.err (!%p450_p9)
}
 0x1a4   :  { %s471_s6 = smov 64   ;;  %s472_s7 = smov 4  }
 0x1a5   :  { %371 = dma.vmem_to_hbm [thread:$0]  %s366_s4, 128, %s541_s5, [#allocation4], %s471_s6, %s471_s6, %s472_s7  }
 0x1a6   :  { %464 = dma.done.wait [#allocation4], 128  }
 0x1a7   :  { %465 = vsyncadd [#allocation4], 4294967168 }
 0x1a8   :  { %375 = vsyncpa [#allocation3], 1 }
 0x1a9   :  { %376 = vsyncpa [#allocation4], 1 }

</bundles_post_ra>
